<compile_context>
chip_gen: v7x
topology: tpu7x:2x2x1
jax: 0.10.0
libtpu: 0.0.40
codegen_flags: <defaults>
</compile_context>

<pallas_src>
import functools

import jax
import jax.numpy as jnp
from jax.experimental import pallas as pl
from jax.experimental.pallas import tpu as pltpu

_SUBLANE = 8          # f32 sublane multiple for batch tiles
_MIN_GRID_STEPS = 8   # aim for >= this many batch tiles (pipelining + megacore)


def _round_up(x: int, m: int) -> int:
    return ((x + m - 1) // m) * m


def conv1d_block_kernel(x_ref, w1_ref, b1_ref, w2_ref, b2_ref, o_ref):
    # x_ref : (TB, Fp)   w1_ref: (Fp, Hp)   b1_ref: (1, Hp)
    # w2_ref: (Hp, Fp)   b2_ref: (1, Fp)    o_ref : (TB, Fp)
    x = x_ref[...]
    # conv1 (center tap only -> matmul) + bias + ReLU
    h = jnp.dot(x, w1_ref[...], preferred_element_type=jnp.float32) + b1_ref[...]
    h = jnp.maximum(h, 0.0)
    if w2_ref.dtype == jnp.bfloat16:   # keep bf16 MXU inputs on the bf16 path
        h = h.astype(jnp.bfloat16)
    # conv2 (center tap only -> matmul) + bias
    y = jnp.dot(h, w2_ref[...], preferred_element_type=jnp.float32) + b2_ref[...]
    o_ref[...] = y.astype(o_ref.dtype)


def prepare_conv1d_block_params(w1, b1, w2, b2, padding=1, *,
                                lane_multiple_f=128, lane_multiple_h=256,
                                dtype=jnp.float32):
    """One-time parameter prep (call at init, NOT per forward).

    w1: (hidden, in_features, k), b1: (hidden,)
    w2: (in_features, hidden, k), b2: (in_features,)

    Returns a dict of lane-padded, pre-transposed arrays ONLY (no Python ints
    — all static dims are re-derived from array shapes inside the jitted
    apply, so nothing gets traced).  Zero padding is exact: padded hidden
    columns are 0 + 0 bias -> relu -> 0, and padded rows/cols contribute 0.
    """
    H, F, k = w1.shape
    assert w2.shape == (F, H, k), "w2 shape must be (in_features, hidden, k)"
    assert b1.shape == (H,) and b2.shape == (F,)
    # L_out == L == 1 (so .squeeze(-1) returns (B, in_features)) requires
    # k == 2*padding + 1; that is also exactly when the center-tap fusion holds.
    assert k == 2 * padding + 1, (
        "Conv1dBlock fusion requires kernel_size == 2*padding + 1")

    Fp = _round_up(F, lane_multiple_f)
    # Hidden dim padded to 256 by default: fills both 256-wide MXU passes on
    # v6e/v7x.  Weights are VMEM-resident, so the extra padding adds no
    # steady-state HBM traffic.  Harmless on v5e (128x128 MXUs).
    Hp = _round_up(H, lane_multiple_h)

    w1c = jnp.transpose(w1[:, :, padding]).astype(jnp.float32)   # (F, H)
    w2c = jnp.transpose(w2[:, :, padding]).astype(jnp.float32)   # (H, F)

    w1p = jnp.zeros((Fp, Hp), jnp.float32).at[:F, :H].set(w1c).astype(dtype)
    w2p = jnp.zeros((Hp, Fp), jnp.float32).at[:H, :F].set(w2c).astype(dtype)
    b1p = jnp.zeros((1, Hp), jnp.float32).at[0, :H].set(b1.astype(jnp.float32))
    b2p = jnp.zeros((1, Fp), jnp.float32).at[0, :F].set(b2.astype(jnp.float32))
    return {"w1": w1p, "b1": b1p, "w2": w2p, "b2": b2p}


def _choose_tile_b(Bp, Fp, Hp, x_itemsize, w_itemsize, block_b, vmem_budget):
    """Largest batch tile that (a) fits the VMEM budget beside the resident
    weights, (b) still yields >= _MIN_GRID_STEPS grid steps when B allows,
    and (c) does not exceed block_b."""
    # Streamed per-row cost: x + out tiles (double-buffered) + f32 h/y temps.
    bytes_per_row = 2 * 2 * Fp * x_itemsize + 4 * (Hp + Fp)
    # Grid-invariant operands (conservatively assume the pipeline keeps two
    # copies; pipeline_mode=pl.Buffered(1) could halve this) + fixed slack.
    resident = 2 * (2 * Fp * Hp * w_itemsize + 4 * (Fp + Hp)) + (2 << 20)
    # TODO(synk): if `resident` alone exceeds the budget (very large F/H on
    # v7x's 64 MiB VMEM), tile Hp with an "arbitrary" grid axis + accumulator
    # instead of keeping both full weight matrices VMEM-resident.
    avail = vmem_budget - resident
    tb_budget = max(_SUBLANE,
                    (avail // max(bytes_per_row, 1)) // _SUBLANE * _SUBLANE)
    tb_steps = max(_SUBLANE, _round_up(pl.cdiv(Bp, _MIN_GRID_STEPS), _SUBLANE))
    tb = min(block_b, tb_budget, tb_steps, Bp)
    return int(max(_SUBLANE, (tb // _SUBLANE) * _SUBLANE))


@functools.partial(jax.jit, static_argnames=("block_b", "vmem_budget_bytes"))
def conv1d_block_apply(x, params, *, block_b=512,
                       vmem_budget_bytes=32 * 1024 * 1024):
    """x: (B, in_features) -> (B, in_features), identical to Conv1dBlock.forward."""
    w1, b1, w2, b2 = params["w1"], params["b1"], params["w2"], params["b2"]
    B, F = x.shape          # static Python ints under jit
    Fp, Hp = w1.shape       # static: derived from array shapes, never traced
    assert w2.shape == (Hp, Fp) and b1.shape == (1, Hp) and b2.shape == (1, Fp)
    assert F <= Fp

    # Pad only what is strictly needed: batch to a sublane multiple, features
    # to the lane-padded weight width.  When x is already aligned this is a
    # no-op (no extra HBM round trip for pad/unpad copies).
    Bp = _round_up(max(B, _SUBLANE), _SUBLANE)
    padded = (Bp, Fp) != (B, F)
    x_in = jnp.pad(x, ((0, Bp - B), (0, Fp - F))) if padded else x

    TB = _choose_tile_b(Bp, Fp, Hp, x.dtype.itemsize, w1.dtype.itemsize,
                        block_b, vmem_budget_bytes)
    grid = (int(pl.cdiv(Bp, TB)),)   # ragged last block is masked by Pallas

    # Explicit scoped-VMEM limit (defaults are only 16 MiB on v5e / 32 MiB on
    # v6e,v7x); sized from the actual tile + resident-weight footprint.
    needed = (2 * 2 * TB * Fp * x.dtype.itemsize          # x/out double-buffered
              + TB * Hp * 4                               # f32 intermediate h
              + 2 * (2 * Fp * Hp * w1.dtype.itemsize + 4 * (Fp + Hp))
              + (2 << 20))
    vmem_limit = int(max(vmem_budget_bytes, needed))

    out = pl.pallas_call(
        conv1d_block_kernel,
        out_shape=jax.ShapeDtypeStruct((Bp, Fp), x.dtype),
        grid=grid,
        in_specs=[
            pl.BlockSpec((TB, Fp), lambda i: (i, 0)),   # x: streamed batch tiles
            pl.BlockSpec((Fp, Hp), lambda i: (0, 0)),   # weights/biases: VMEM-resident
            pl.BlockSpec((1, Hp), lambda i: (0, 0)),
            pl.BlockSpec((Hp, Fp), lambda i: (0, 0)),
            pl.BlockSpec((1, Fp), lambda i: (0, 0)),
        ],
        out_specs=pl.BlockSpec((TB, Fp), lambda i: (i, 0)),
        compiler_params=pltpu.CompilerParams(
            # batch tiles are independent -> shard across TCs on v7x megacore
            dimension_semantics=("parallel",),
            vmem_limit_bytes=vmem_limit),
    )(x_in, w1, b1, w2, b2)

    return out[:B, :F] if padded else out


def conv1d_block(x, w1, b1, w2, b2, padding=1):
    """Convenience one-shot wrapper (prep + apply)."""
    params = prepare_conv1d_block_params(w1, b1, w2, b2, padding=padding)
    return conv1d_block_apply(x, params)


def conv1d_block_ref(x, w1, b1, w2, b2, padding=1):
    # Pure-JAX reference replicating PyTorch exactly (full conv over L=1).
    xp = x[:, :, None]                                       # (B, F, 1)
    xp = jnp.pad(xp, ((0, 0), (0, 0), (padding, padding)))   # (B, F, 1+2p)
    k = w1.shape[-1]
    h = jnp.einsum('bcl,ocl->bo', xp[:, :, :k], w1) + b1     # (B, H)
    h = jnp.maximum(h, 0.0)
    hp = jnp.pad(h[:, :, None], ((0, 0), (0, 0), (padding, padding)))
    y = jnp.einsum('bcl,ocl->bo', hp[:, :, :k], w2) + b2     # (B, F)
    return y


if __name__ == "__main__":
    # NOTE: this toy size is launch-overhead bound; the tiling/VMEM logic only
    # matters at realistic B/F/H.
    B, in_features, hidden, ksize, padding = 8, 4, 32, 3, 1

    key = jax.random.PRNGKey(0)
    kx, k1, k2, k3, k4 = jax.random.split(key, 5)

    x = jax.random.normal(kx, (B, in_features), dtype=jnp.float32)

    # Deterministic parameter init (PyTorch-Conv1d-style uniform bounds).
    bound1 = 1.0 / (in_features * ksize) ** 0.5
    bound2 = 1.0 / (hidden * ksize) ** 0.5
    w1 = jax.random.uniform(k1, (hidden, in_features, ksize),
                            minval=-bound1, maxval=bound1, dtype=jnp.float32)
    b1 = jax.random.uniform(k2, (hidden,), minval=-bound1, maxval=bound1,
                            dtype=jnp.float32)
    w2 = jax.random.uniform(k3, (in_features, hidden, ksize),
                            minval=-bound2, maxval=bound2, dtype=jnp.float32)
    b2 = jax.random.uniform(k4, (in_features,), minval=-bound2, maxval=bound2,
                            dtype=jnp.float32)

    # Hoisted one-time weight prep, then the fused Pallas forward.
    params = prepare_conv1d_block_params(w1, b1, w2, b2, padding=padding)
    out = jax.block_until_ready(conv1d_block_apply(x, params))

    ref = conv1d_block_ref(x, w1, b1, w2, b2, padding=padding)
    assert out.shape == (B, in_features)
    assert jnp.allclose(out, ref, atol=1e-5, rtol=1e-5), "mismatch vs reference"

    print("KERNEL_OK")
</pallas_src>

<mosaic_0001>
module attributes {stable_mosaic.version = 11 : i64} {
  func.func @conv1d_block_kernel(%arg0: i32, %arg1: memref<8x128xf32, #tpu.memory_space<vmem>>, %arg2: memref<128x256xf32, #tpu.memory_space<vmem>>, %arg3: memref<1x256xf32, #tpu.memory_space<vmem>>, %arg4: memref<256x128xf32, #tpu.memory_space<vmem>>, %arg5: memref<1x128xf32, #tpu.memory_space<vmem>>, %arg6: memref<8x128xf32, #tpu.memory_space<vmem>>) attributes {dimension_semantics = [#tpu.dimension_semantics<parallel>], iteration_bounds = array<i64: 1>, scalar_prefetch = 0 : i64, scratch_operands = 0 : i64, tpu.core_type = #tpu.core_type<tc>, window_params = [{transform_indices = @transform_0, window_bounds = array<i64: 8, 128>}, {pipeline_mode = #tpu.pipeline_mode<synchronous>, transform_indices = @transform_1, window_bounds = array<i64: 128, 256>}, {pipeline_mode = #tpu.pipeline_mode<synchronous>, transform_indices = @transform_2, window_bounds = array<i64: 1, 256>}, {pipeline_mode = #tpu.pipeline_mode<synchronous>, transform_indices = @transform_3, window_bounds = array<i64: 256, 128>}, {pipeline_mode = #tpu.pipeline_mode<synchronous>, transform_indices = @transform_4, window_bounds = array<i64: 1, 128>}, {transform_indices = @transform_5, window_bounds = array<i64: 8, 128>}]} {
    %c0 = arith.constant 0 : index
    %c0_0 = arith.constant 0 : index
    %0 = vector.load %arg1[%c0, %c0_0] : memref<8x128xf32, #tpu.memory_space<vmem>>, vector<8x128xf32>
    %c0_1 = arith.constant 0 : index
    %c0_2 = arith.constant 0 : index
    %1 = vector.load %arg2[%c0_1, %c0_2] : memref<128x256xf32, #tpu.memory_space<vmem>>, vector<128x256xf32>
    %cst = arith.constant dense<0.000000e+00> : vector<8x256xf32>
    %2 = tpu.matmul %0, %1, %cst {dimension_numbers = #tpu.dot_dimension_numbers<[1], [0], [0], [1], [0, 0, 1, 1], [], []>} : vector<8x128xf32>, vector<128x256xf32>, vector<8x256xf32> -> vector<8x256xf32>
    %c0_3 = arith.constant 0 : index
    %c0_4 = arith.constant 0 : index
    %3 = vector.load %arg3[%c0_3, %c0_4] : memref<1x256xf32, #tpu.memory_space<vmem>>, vector<1x256xf32>
    %4 = vector.broadcast %3 : vector<1x256xf32> to vector<8x256xf32>
    %5 = arith.addf %2, %4 : vector<8x256xf32>
    %cst_5 = arith.constant 0.000000e+00 : f32
    %6 = vector.broadcast %cst_5 : f32 to vector<8x256xf32>
    %7 = arith.maximumf %5, %6 : vector<8x256xf32>
    %c0_6 = arith.constant 0 : index
    %c0_7 = arith.constant 0 : index
    %8 = vector.load %arg4[%c0_6, %c0_7] : memref<256x128xf32, #tpu.memory_space<vmem>>, vector<256x128xf32>
    %cst_8 = arith.constant dense<0.000000e+00> : vector<8x128xf32>
    %9 = tpu.matmul %7, %8, %cst_8 {dimension_numbers = #tpu.dot_dimension_numbers<[1], [0], [0], [1], [0, 0, 1, 1], [], []>} : vector<8x256xf32>, vector<256x128xf32>, vector<8x128xf32> -> vector<8x128xf32>
    %c0_9 = arith.constant 0 : index
    %c0_10 = arith.constant 0 : index
    %10 = vector.load %arg5[%c0_9, %c0_10] : memref<1x128xf32, #tpu.memory_space<vmem>>, vector<1x128xf32>
    %11 = vector.broadcast %10 : vector<1x128xf32> to vector<8x128xf32>
    %12 = arith.addf %9, %11 : vector<8x128xf32>
    %c0_11 = arith.constant 0 : index
    %c0_12 = arith.constant 0 : index
    %13 = vector.load %arg6[%c0_11, %c0_12] : memref<8x128xf32, #tpu.memory_space<vmem>>, vector<8x128xf32>
    tpu.vector_store %arg6[%c0_11, %c0_12], %12 {strides = array<i32>} : memref<8x128xf32, #tpu.memory_space<vmem>>, vector<8x128xf32>,
    return
  }
  func.func @transform_0(%arg0: i32) -> (i32, i32) {
    %c0_i32 = arith.constant 0 : i32
    %c0_i32_0 = arith.constant 0 : i32
    return %arg0, %c0_i32 : i32, i32
  }
  func.func @transform_1(%arg0: i32) -> (i32, i32) {
    %c0_i32 = arith.constant 0 : i32
    %c0_i32_0 = arith.constant 0 : i32
    %c0_i32_1 = arith.constant 0 : i32
    return %c0_i32, %c0_i32_0 : i32, i32
  }
  func.func @transform_2(%arg0: i32) -> (i32, i32) {
    %c0_i32 = arith.constant 0 : i32
    %c0_i32_0 = arith.constant 0 : i32
    %c0_i32_1 = arith.constant 0 : i32
    return %c0_i32, %c0_i32_0 : i32, i32
  }
  func.func @transform_3(%arg0: i32) -> (i32, i32) {
    %c0_i32 = arith.constant 0 : i32
    %c0_i32_0 = arith.constant 0 : i32
    %c0_i32_1 = arith.constant 0 : i32
    return %c0_i32, %c0_i32_0 : i32, i32
  }
  func.func @transform_4(%arg0: i32) -> (i32, i32) {
    %c0_i32 = arith.constant 0 : i32
    %c0_i32_0 = arith.constant 0 : i32
    %c0_i32_1 = arith.constant 0 : i32
    return %c0_i32, %c0_i32_0 : i32, i32
  }
  func.func @transform_5(%arg0: i32) -> (i32, i32) {
    %c0_i32 = arith.constant 0 : i32
    %c0_i32_0 = arith.constant 0 : i32
    return %arg0, %c0_i32 : i32, i32
  }
}

</mosaic_0001>

<bundles_post_ra>
// kernel: conv1d_block_apply.1
= control target key start
LH: loop header
LB: loop body
LE: loop exit
PB: predicated region body
PF: predicated region fallthrough
CT: control target
= control target key end

     0   :  { %10 = vsyncpa [#allocation3], 0  ;;  %s510_s0 = inlined_call_operand.vmem [shape: f32[8,128], index: 0, kind: input, shape index: {}]   ;;  %s511_s1 = inlined_call_operand.hbm [shape: f32[128,256], index: 1, kind: input, shape index: {}]   ;;  %s512_s2 = inlined_call_operand.vmem [shape: f32[1,256], index: 2, kind: input, shape index: {}]   ;;  %s513_s3 = inlined_call_operand.hbm [shape: f32[256,128], index: 3, kind: input, shape index: {}]   ;;  %s514_s4 = inlined_call_operand.vmem [shape: f32[1,128], index: 4, kind: input, shape index: {}]   ;;  %s515_s5 = inlined_call_operand.vmem [shape: f32[8,128], index: 5, kind: output, shape index: {}]  }
   0x1   :  { %11 = vsyncpa [#allocation5], 0  ;;  %s437_s18 = smov [#allocation2]   ;;  %s389_s22 = scalar_lea.hbm %s511_s1, 4096 }
   0x2   :  { %s19_s19 = sshll.u32 %s437_s18, 4  ;;  %p390_p0 = scmp.ne.s32.totalorder %s511_s1, %s389_s22  ;;  %s20_s19 = int_to_ptr.vmem [resolvable:$true] %s19_s19 }
   0x3   :  { %p393_p1 = scmp.lt.u32.totalorder %s389_s22, %s511_s1 }
   0x5   :  { %p395_p2 = pnand %p393_p1, %p390_p0 }
   0x7   :  { %398 = shalt.err (!%p395_p2)
}
   0x8   :  { %s399_s27 = scalar_lea.vmem %s20_s19, 4096  ;;  %p404_p4 = scmp.lt.s32.totalorder %s20_s19, %s20_s19 }
   0x9   :  { %p400_p3 = scmp.ne.s32.totalorder %s20_s19, %s399_s27  ;;  %p405_p5 = scmp.lt.s32.totalorder %s399_s27, %s399_s27 }
   0xb   :  { %p406_p6 = por %p405_p5, %p404_p4 }
   0xd   :  { %p407_p7 = pnand %p406_p6, %p400_p3 }
   0xf   :  { %410 = shalt.err (!%p407_p7)
}
  0x10   :  { %s438_s28 = smov 256   ;;  %s439_s29 = smov 16  }
  0x11   :  { %25 = dma.hbm_to_vmem [thread:$0]  %s511_s1, 4096, %s20_s19, [#allocation3], %s438_s28, %s438_s28, %s439_s29  }
  0x12   :  { %s440_s7 = smov [#allocation4]   ;;  %s411_s11 = scalar_lea.hbm %s513_s3, 4096 }
  0x13   :  { %s33_s8 = sshll.u32 %s440_s7, 4  ;;  %p412_p8 = scmp.ne.s32.totalorder %s513_s3, %s411_s11  ;;  %s34_s8 = int_to_ptr.vmem [resolvable:$true] %s33_s8 }
  0x14   :  { %p415_p9 = scmp.lt.u32.totalorder %s411_s11, %s513_s3 }
  0x16   :  { %p417_p10 = pnand %p415_p9, %p412_p8 }
  0x18   :  { %420 = shalt.err (!%p417_p10)
}
  0x19   :  { %s421_s16 = scalar_lea.vmem %s34_s8, 4096  ;;  %p426_p12 = scmp.lt.s32.totalorder %s34_s8, %s34_s8 }
  0x1a   :  { %p422_p11 = scmp.ne.s32.totalorder %s34_s8, %s421_s16  ;;  %p427_p13 = scmp.lt.s32.totalorder %s421_s16, %s421_s16 }
  0x1c   :  { %p428_p0 = por %p427_p13, %p426_p12 }
  0x1e   :  { %p429_p1 = pnand %p428_p0, %p422_p11 }
  0x20   :  { %432 = shalt.err (!%p429_p1)
}
  0x21   :  { %s441_s1 = smov 128   ;;  %s442_s17 = smov 8  }
  0x22   :  { %39 = dma.hbm_to_vmem [thread:$0]  %s513_s3, 4096, %s34_s8, [#allocation5], %s441_s1, %s441_s1, %s442_s17  }
  0x23   :  { %433 = dma.done.wait [#allocation3], 4096  }
  0x24   :  { %434 = vsyncadd [#allocation3], 4294963200 }
  0x25   :  { %435 = dma.done.wait [#allocation5], 4096  }
  0x26   :  { %436 = vsyncadd [#allocation5], 4294963200  ;;  %v443_v0 = vmov 0.0   ;;  %v50_v1 = vld [vmem:[#allocation2 + $0x8] sm:$0xff]  ;;  %v52_v2 = vld [vmem:[#allocation2 + $0x18] sm:$0xff] }
  0x27   :  { %157 = vmatprep.mubr.f32.mxu0 %v443_v0  ;;  %v49_v3 = vld [vmem:[#allocation2] sm:$0xff]  ;;  %v318_v4 = vpack.c.bf16 %v52_v2, %v50_v1  ;;  %v51_v5 = vld [vmem:[#allocation2 + $0x10] sm:$0xff]  ;;  %v54_v6 = vld [vmem:[#allocation2 + $0x28] sm:$0xff] }
  0x28   :  { %v56_v7 = vld [vmem:[#allocation2 + $0x38] sm:$0xff]  ;;  %v320_v8 = vpack.c.bf16 %v51_v5, %v49_v3  ;;  %v53_v10 = vld [vmem:[#allocation2 + $0x20] sm:$0xff]  ;;  %v55_v11 = vld [vmem:[#allocation2 + $0x30] sm:$0xff] }
  0x29   :  { %v322_v9 = vpack.c.bf16 %v56_v7, %v54_v6  ;;  %v58_v12 = vld [vmem:[#allocation2 + $0x48] sm:$0xff]  ;;  %319 = vmatprep.subr.bf16.mxu0 %v318_v4  ;;  %v60_v13 = vld [vmem:[#allocation2 + $0x58] sm:$0xff]  ;;  %v324_v14 = vpack.c.bf16 %v55_v11, %v53_v10  ;;  %v57_v16 = vld [vmem:[#allocation2 + $0x40] sm:$0xff] }
  0x2a   :  { %321 = vmatpush1.bf16.msra.mxu0 %v320_v8  ;;  %v326_v15 = vpack.c.bf16 %v60_v13, %v58_v12  ;;  %v59_v17 = vld [vmem:[#allocation2 + $0x50] sm:$0xff]  ;;  %v62_v18 = vld [vmem:[#allocation2 + $0x68] sm:$0xff]  ;;  %v64_v19 = vld [vmem:[#allocation2 + $0x78] sm:$0xff] }
  0x2b   :  { %323 = vmatprep.subr.bf16.mxu0 %v322_v9  ;;  %v328_v20 = vpack.c.bf16 %v59_v17, %v57_v16  ;;  %v330_v21 = vpack.c.bf16 %v64_v19, %v62_v18  ;;  %v61_v22 = vld [vmem:[#allocation2 + $0x60] sm:$0xff]  ;;  %v63_v23 = vld [vmem:[#allocation2 + $0x70] sm:$0xff]  ;;  %v66_v24 = vld [vmem:[#allocation2 + $0x88] sm:$0xff] }
  0x2c   :  { %v68_v25 = vld [vmem:[#allocation2 + $0x98] sm:$0xff]  ;;  %v65_v26 = vld [vmem:[#allocation2 + $0x80] sm:$0xff]  ;;  %v67_v27 = vld [vmem:[#allocation2 + $0x90] sm:$0xff]  ;;  %v332_v31 = vpack.c.bf16 %v63_v23, %v61_v22 }
  0x2d   :  { %v182_v28 = vld [vmem:[#allocation4 + $0x80] sm:$0xff]  ;;  %v183_v29 = vld [vmem:[#allocation4 + $0x88] sm:$0xff]  ;;  %v184_v34 = vld [vmem:[#allocation4 + $0x90] sm:$0xff]  ;;  %v334_v36 = vpack.c.bf16 %v68_v25, %v66_v24  ;;  %v336_v46 = vpack.c.bf16 %v67_v27, %v65_v26 }
  0x2e   :  { %325 = vmatpush1.bf16.msra.mxu0 %v324_v14  ;;  %v166_v30 = vld [vmem:[#allocation4] sm:$0xff]  ;;  %v350_v32 = vpack.c.bf16 %v183_v29, %v182_v28  ;;  %v167_v33 = vld [vmem:[#allocation4 + $0x8] sm:$0xff]  ;;  %v185_v35 = vld [vmem:[#allocation4 + $0x98] sm:$0xff] }
  0x2f   :  { %327 = vmatprep.subr.bf16.mxu0 %v326_v15  ;;  %v352_v37 = vpack.c.bf16 %v167_v33, %v166_v30  ;;  %v354_v38 = vpack.c.bf16 %v185_v35, %v184_v34  ;;  %v168_v39 = vld [vmem:[#allocation4 + $0x10] sm:$0xff]  ;;  %v169_v40 = vld [vmem:[#allocation4 + $0x18] sm:$0xff]  ;;  %v186_v41 = vld [vmem:[#allocation4 + $0xa0] sm:$0xff]  ;;  %v83_v34 = vlaneseq }
  0x30   :  { %v70_v42 = vld [vmem:[#allocation2 + $0xa8] sm:$0xff]  ;;  %v72_v43 = vld [vmem:[#allocation2 + $0xb8] sm:$0xff]  ;;  %351 = vmatprep.subr.bf16.mxu1 %v350_v32  ;;  %v356_v45 = vpack.c.bf16 %v169_v40, %v168_v39  ;;  %v69_v47 = vld [vmem:[#allocation2 + $0xa0] sm:$0xff] }
  0x31   :  { %v187_v44 = vld [vmem:[#allocation4 + $0xa8] sm:$0xff]  ;;  %353 = vmatpush3.bf16.msra.mxu1 %v352_v37  ;;  %v170_v49 = vld [vmem:[#allocation4 + $0x20] sm:$0xff]  ;;  %v338_v51 = vpack.c.bf16 %v72_v43, %v70_v42  ;;  %v71_v52 = vld [vmem:[#allocation2 + $0xb0] sm:$0xff]  ;;  %v84_v35 = vshrl.u32 %v83_v34, 7 }
  0x32   :  { %329 = vmatpush1.bf16.msra.mxu0 %v328_v20  ;;  %355 = vmatprep.subr.bf16.mxu1 %v354_v38  ;;  %v358_v48 = vpack.c.bf16 %v187_v44, %v186_v41  ;;  %v171_v50 = vld [vmem:[#allocation4 + $0x28] sm:$0xff]  ;;  %v188_v53 = vld [vmem:[#allocation4 + $0xb0] sm:$0xff]  ;;  %v189_v54 = vld [vmem:[#allocation4 + $0xb8] sm:$0xff]  ;;  %v340_v58 = vpack.c.bf16 %v71_v52, %v69_v47 }
  0x33   :  { %331 = vmatprep.subr.bf16.mxu0 %v330_v21  ;;  %v74_v55 = vld [vmem:[#allocation2 + $0xc8] sm:$0xff]  ;;  %v76_v56 = vld [vmem:[#allocation2 + $0xd8] sm:$0xff]  ;;  %v360_v57 = vpack.c.bf16 %v171_v50, %v170_v49  ;;  %v73_v59 = vld [vmem:[#allocation2 + $0xc0] sm:$0xff]  ;;  %v362_v60 = vpack.c.bf16 %v189_v54, %v188_v53  ;;  %v89_v38 = vsub.s32 1, %v84_v35 }
  0x34   :  { %v172_v61 = vld [vmem:[#allocation4 + $0x30] sm:$0xff]  ;;  %v173_v62 = vld [vmem:[#allocation4 + $0x38] sm:$0xff]  ;;  %v342_v63 = vpack.c.bf16 %v76_v56, %v74_v55  ;;  %v190_v1 = vld [vmem:[#allocation4 + $0xc0] sm:$0xff] }
  0x35   :  { %357 = vmatpush3.bf16.msra.mxu1 %v356_v45  ;;  %v75_v0 = vld [vmem:[#allocation2 + $0xd0] sm:$0xff]  ;;  %v191_v2 = vld [vmem:[#allocation4 + $0xc8] sm:$0xff]  ;;  %v80_v4 = vld [vmem:[#allocation2 + $0xf8] sm:$0xff]  ;;  %v364_v5 = vpack.c.bf16 %v173_v62, %v172_v61 }
  0x36   :  { %333 = vmatpush1.bf16.msra.mxu0 %v332_v31  ;;  %359 = vmatprep.subr.bf16.mxu1 %v358_v48  ;;  %v78_v3 = vld [vmem:[#allocation2 + $0xe8] sm:$0xff]  ;;  %v344_v6 = vpack.c.bf16 %v75_v0, %v73_v59  ;;  %v77_v7 = vld [vmem:[#allocation2 + $0xe0] sm:$0xff]  ;;  %v366_v8 = vpack.c.bf16 %v191_v2, %v190_v1  ;;  %v79_v12 = vld [vmem:[#allocation2 + $0xf0] sm:$0xff] }
  0x37   :  { %335 = vmatprep.subr.bf16.mxu0 %v334_v36  ;;  %v174_v9 = vld [vmem:[#allocation4 + $0x40] sm:$0xff]  ;;  %v175_v10 = vld [vmem:[#allocation4 + $0x48] sm:$0xff]  ;;  %v346_v11 = vpack.c.bf16 %v80_v4, %v78_v3  ;;  %v192_v13 = vld [vmem:[#allocation4 + $0xd0] sm:$0xff]  ;;  %v348_v16 = vpack.c.bf16 %v79_v12, %v77_v7  ;;  %v85_v36 = vsub.s32 0, %v84_v35 }
  0x38   :  { %v193_v14 = vld [vmem:[#allocation4 + $0xd8] sm:$0xff]  ;;  %v368_v15 = vpack.c.bf16 %v175_v10, %v174_v9  ;;  %v176_v18 = vld [vmem:[#allocation4 + $0x50] sm:$0xff]  ;;  %v194_v20 = vld [vmem:[#allocation4 + $0xe0] sm:$0xff] }
  0x39   :  { %361 = vmatpush3.bf16.msra.mxu1 %v360_v57  ;;  %v370_v17 = vpack.c.bf16 %v193_v14, %v192_v13  ;;  %v177_v19 = vld [vmem:[#allocation4 + $0x58] sm:$0xff]  ;;  %v195_v21 = vld [vmem:[#allocation4 + $0xe8] sm:$0xff]  ;;  %v48_v23 = vld [vmem:[%s510_s0] sm:$0xff] }
  0x3a   :  { %337 = vmatpush1.bf16.msra.mxu0 %v336_v46  ;;  %363 = vmatprep.subr.bf16.mxu1 %v362_v60  ;;  %v372_v22 = vpack.c.bf16 %v177_v19, %v176_v18  ;;  %v374_v24 = vpack.c.bf16 %v195_v21, %v194_v20  ;;  %v178_v25 = vld [vmem:[#allocation4 + $0x60] sm:$0xff]  ;;  %v179_v26 = vld [vmem:[#allocation4 + $0x68] sm:$0xff]  ;;  %v196_v28 = vld [vmem:[#allocation4 + $0xf0] sm:$0xff] }
  0x3b   :  { %339 = vmatprep.subr.bf16.mxu0 %v338_v51  ;;  %v376_v27 = vpack.c.bf16 %v179_v26, %v178_v25  ;;  %v197_v29 = vld [vmem:[#allocation4 + $0xf8] sm:$0xff]  ;;  %v180_v31 = vld [vmem:[#allocation4 + $0x70] sm:$0xff]  ;;  %v81_v37 = vld [vmem:[%s512_s2] sm:$0x3] }
  0x3c   :  { %v378_v30 = vpack.c.bf16 %v197_v29, %v196_v28  ;;  %v181_v32 = vld [vmem:[#allocation4 + $0x78] sm:$0xff]  ;;  %v86_v39 = vrot.slane %v81_v37, %v85_v36  ;;  %v90_v40 = vrot.slane %v81_v37, %v89_v38  ;;  %v282_v48 = vld [vmem:[%s514_s4] ss:$0 sm:$0xff] }
  0x3d   :  { %365 = vmatpush3.bf16.msra.mxu1 %v364_v5  ;;  %v380_v33 = vpack.c.bf16 %v181_v32, %v180_v31 }
  0x3e   :  { %341 = vmatpush1.bf16.msra.mxu0 %v340_v58  ;;  %367 = vmatprep.subr.bf16.mxu1 %v366_v8 }
  0x3f   :  { %343 = vmatprep.subr.bf16.mxu0 %v342_v63 }
  0x41   :  { %369 = vmatpush3.bf16.msra.mxu1 %v368_v15 }
  0x42   :  { %345 = vmatpush1.bf16.msra.mxu0 %v344_v6  ;;  %371 = vmatprep.subr.bf16.mxu1 %v370_v17 }
  0x43   :  { %347 = vmatprep.subr.bf16.mxu0 %v346_v11 }
  0x45   :  { %373 = vmatpush3.bf16.msra.mxu1 %v372_v22 }
  0x46   :  { %349 = vmatpush1.bf16.msra.mxu0 %v348_v16  ;;  %375 = vmatprep.subr.bf16.mxu1 %v374_v24 }
  0x49   :  { %158 = vmatmul.mubr.f32.vlgmr.msra.gmra.mrb[0].mxu0 %v48_v23  ;;  %377 = vmatpush3.bf16.msra.mxu1 %v376_v27 }
  0x4a   :  { %379 = vmatprep.subr.bf16.mxu1 %v378_v30 }
  0x4d   :  { %381 = vmatpush3.bf16.msra.mxu1 %v380_v33 }
 0x11c   :  { %v159_v41 = vpop.f32.mrb[0].mxu0 }
 0x11d   :  { %v160_v42 = vadd.f32 %v159_v41, %v86_v39  ;;  %v161_v43 = vpop.f32.mrb[1].mxu0 }
 0x11e   :  { %v162_v44 = vadd.f32 %v161_v43, %v90_v40 }
 0x11f   :  { %v164_v46 = vmax.f32 %v160_v42, 0.0 }
 0x120   :  { %v165_v45 = vmax.f32 %v162_v44, 0.0 }
 0x122   :  { %269 = vmatprep.mubr.f32.mxu1 %v165_v45 }
 0x123   :  { %270 = vmatmul.mubr.f32.vlgmr.msra.gmra.mrb[0].mxu1 %v164_v46 }
 0x1f6   :  { %v315_v47 = vpop.f32.mrb[0].mxu1 }
 0x1f7   :  { %v316_v49 = vpop.f32.mrb[1].mxu1 }
 0x1f8   :  { %v317_v50 = vadd.f32 %v316_v49, %v315_v47 }
 0x1fa   :  { %v272_v51 = vadd.f32 %v317_v50, %v282_v48 }
 0x1fc   :  { %275 = vst [vmem:[%s515_s5] sm:$0xff] %v272_v51 }
 0x1fd   :  { %280 = vsyncpa [#allocation3], 1 }
 0x1fe   :  { %281 = vsyncpa [#allocation5], 1 }

</bundles_post_ra>
